<compile_context>
chip_gen: v6e
topology: v6e:2x2x1
jax: 0.10.0
libtpu: 0.0.40
codegen_flags: <defaults>
</compile_context>

<pallas_src>
import jax
import jax.numpy as jnp
from jax import lax
from jax.experimental import pallas as pl
from jax.experimental.pallas import tpu as pltpu


def _l2norm_kernel(x_ref, o_ref):
    # x_ref / o_ref: (TILE_B, H) tile in VMEM.
    x = x_ref[...].astype(jnp.float32)          # f32 math (required on v5e VPU/EUP)
    sq_sum = jnp.sum(x * x, axis=-1, keepdims=True)
    inv_norm = lax.rsqrt(sq_sum)                # EUP op; broadcast multiply on VPU
    o_ref[...] = (x * inv_norm).astype(o_ref.dtype)


def _round_up(n: int, m: int) -> int:
    return ((n + m - 1) // m) * m


def _pick_tile_b(B: int, H: int, itemsize: int,
                 target_block_bytes: int = 2 << 20) -> int:
    """Largest batch tile (multiple of 8 sublanes) s.t. one block is ~2 MiB,
    but never larger than the (sublane-padded) batch itself."""
    row_bytes = max(1, H * itemsize)
    tile_b = max(8, (target_block_bytes // row_bytes) // 8 * 8)
    tile_b = min(tile_b, _round_up(B, 8))
    return int(tile_b)


def l2norm(x: jax.Array, *, tile_b: int | None = None) -> jax.Array:
    """L2-normalize each row of a (B, H) array (PyTorch L2Norm with axis=1)."""
    B, H = x.shape
    if tile_b is None:
        tile_b = _pick_tile_b(B, H, jnp.dtype(x.dtype).itemsize)

    grid = (pl.cdiv(B, tile_b),)

    # Double-buffered in + out blocks, with some headroom.
    block_bytes = tile_b * H * max(4, jnp.dtype(x.dtype).itemsize)
    vmem_limit = min(128 << 20, max(16 << 20, 6 * block_bytes))

    return pl.pallas_call(
        _l2norm_kernel,
        out_shape=jax.ShapeDtypeStruct((B, H), x.dtype),
        grid=grid,
        in_specs=[pl.BlockSpec((tile_b, H), lambda i: (i, 0))],
        out_specs=pl.BlockSpec((tile_b, H), lambda i: (i, 0)),
        compiler_params=pltpu.CompilerParams(
            dimension_semantics=("parallel",),
            vmem_limit_bytes=vmem_limit,
        ),
    )(x)


def _reference(x):
    return x / jnp.linalg.norm(x, ord=2, axis=1, keepdims=True)


if __name__ == "__main__":
    key = jax.random.PRNGKey(0)

    # Shapes consistent with the module: hidden_size=128 embeddings,
    # small batch (L2Norm operates on (batch, hidden)).
    B, H = 16, 128
    x = jax.random.normal(key, (B, H), dtype=jnp.float32)
    out = jax.block_until_ready(l2norm(x))
    ref = _reference(x)
    assert out.shape == (B, H)
    assert jnp.allclose(out, ref, atol=1e-5, rtol=1e-5)

    # Ragged batch (not a multiple of the tile / sublane count) — exercises the
    # cdiv + block-padding path.
    B2 = 19
    x2 = jax.random.normal(jax.random.PRNGKey(1), (B2, H), dtype=jnp.float32)
    out2 = jax.block_until_ready(l2norm(x2))
    ref2 = _reference(x2)
    assert out2.shape == (B2, H)
    assert jnp.allclose(out2, ref2, atol=1e-5, rtol=1e-5)

    print("KERNEL_OK")
</pallas_src>

<mosaic_0001>
module attributes {stable_mosaic.version = 11 : i64} {
  func.func @_l2norm_kernel(%arg0: i32, %arg1: memref<16x128xf32, #tpu.memory_space<vmem>>, %arg2: memref<16x128xf32, #tpu.memory_space<vmem>>) attributes {dimension_semantics = [#tpu.dimension_semantics<parallel>], iteration_bounds = array<i64: 1>, scalar_prefetch = 0 : i64, scratch_operands = 0 : i64, tpu.core_type = #tpu.core_type<tc>, window_params = [{transform_indices = @transform_0, window_bounds = array<i64: 16, 128>}, {transform_indices = @transform_1, window_bounds = array<i64: 16, 128>}]} {
    %c0 = arith.constant 0 : index
    %c0_0 = arith.constant 0 : index
    %0 = vector.load %arg1[%c0, %c0_0] : memref<16x128xf32, #tpu.memory_space<vmem>>, vector<16x128xf32>
    %1 = arith.mulf %0, %0 : vector<16x128xf32>
    %cst = arith.constant dense<0.000000e+00> : vector<16xf32>
    %2 = vector.multi_reduction <add>, %1, %cst [1] : vector<16x128xf32> to vector<16xf32>
    %3 = vector.shape_cast %2 : vector<16xf32> to vector<16x1xf32>
    %4 = math.rsqrt %3 : vector<16x1xf32>
    %5 = vector.broadcast %4 : vector<16x1xf32> to vector<16x128xf32>
    %6 = arith.mulf %0, %5 : vector<16x128xf32>
    %c0_1 = arith.constant 0 : index
    %c0_2 = arith.constant 0 : index
    %7 = vector.load %arg2[%c0_1, %c0_2] : memref<16x128xf32, #tpu.memory_space<vmem>>, vector<16x128xf32>
    tpu.vector_store %arg2[%c0_1, %c0_2], %6 {strides = array<i32>} : memref<16x128xf32, #tpu.memory_space<vmem>>, vector<16x128xf32>,
    return
  }
  func.func @transform_0(%arg0: i32) -> (i32, i32) {
    %c0_i32 = arith.constant 0 : i32
    %c0_i32_0 = arith.constant 0 : i32
    return %arg0, %c0_i32 : i32, i32
  }
  func.func @transform_1(%arg0: i32) -> (i32, i32) {
    %c0_i32 = arith.constant 0 : i32
    %c0_i32_0 = arith.constant 0 : i32
    return %arg0, %c0_i32 : i32, i32
  }
}

</mosaic_0001>

<bundles_post_ra>
// kernel: tpu_custom_call.1
= control target key start
LH: loop header
LB: loop body
LE: loop exit
PB: predicated region body
PF: predicated region fallthrough
CT: control target
= control target key end

     0   :  { %6 = vsyncpa [#allocation3], 0  ;;  %s132_s0 = inlined_call_operand.hbm [shape: f32[16,128], index: 0, kind: input, shape index: {}]   ;;  %s133_s1 = inlined_call_operand.hbm [shape: f32[16,128], index: 1, kind: output, shape index: {}]  }
   0x1   :  { %7 = vsyncpa [#allocation4], 0  ;;  %s106_s6 = smov [#allocation2]  }
   0x2   :  { %s13_s7 = sshll.u32 %s106_s6, 4  ;;  %s14_s7 = int_to_ptr.vmem [resolvable:$true] %s13_s7 }
   0x3   :  { %s70_s8 = scalar_lea.vmem %s14_s7, 256  ;;  %p75_p1 = scmp.lt.s32.totalorder %s14_s7, %s14_s7 }
   0x4   :  { %p71_p0 = scmp.ne.s32.totalorder %s14_s7, %s70_s8  ;;  %p76_p2 = scmp.lt.s32.totalorder %s70_s8, %s70_s8 }
   0x6   :  { %p77_p3 = por %p76_p2, %p75_p1 }
   0x8   :  { %p78_p4 = pnand %p77_p3, %p71_p0 }
   0xa   :  { %81 = shalt.err (!%p78_p4)
}
   0xb   :  { %s107_s9 = smov 128   ;;  %s108_s10 = smov 8  }
   0xc   :  { %19 = dma.hbm_to_vmem [thread:$0]  %s132_s0, 256, %s14_s7, [#allocation3], %s107_s9, %s107_s9, %s108_s10  }
   0xd   :  { %102 = dma.done.wait [#allocation3], 256  }
   0xe   :  { %103 = vsyncadd [#allocation3], 4294967040  ;;  %v23_v0 = vld [vmem:[#allocation2] sm:$0xff]  ;;  %v24_v1 = vld [vmem:[#allocation2 + $0x8] sm:$0xff]  ;;  %s109_s13 = smov [#allocation5]  }
   0xf   :  { %v25_v2 = vmul.f32 %v23_v0, %v23_v0  ;;  %v26_v3 = vmul.f32 %v24_v1, %v24_v1  ;;  %s42_s14 = sshll.u32 %s109_s13, 4  ;;  %s43_s14 = int_to_ptr.vmem [resolvable:$true] %s42_s14 }
  0x10   :  { %s82_s0 = scalar_lea.vmem %s43_s14, 256  ;;  %p87_p6 = scmp.lt.s32.totalorder %s43_s14, %s43_s14 }
  0x11   :  { %27 = vadd.xlane.f32.xlu0 %v25_v2  ;;  %p83_p5 = scmp.ne.s32.totalorder %s43_s14, %s82_s0  ;;  %p88_p7 = scmp.lt.s32.totalorder %s82_s0, %s82_s0 }
  0x13   :  { %p89_p8 = por %p88_p7, %p87_p6 }
  0x15   :  { %29 = vadd.xlane.f32.xlu0 %v26_v3  ;;  %p90_p9 = pnand %p89_p8, %p83_p5 }
  0x9a   :  { %v28_v4 = vpop.xlane.xlu0 %27 }
  0x9b   :  { %58 = vrsqrt.f32 %v28_v4 }
  0x9e   :  { %v30_v5 = vpop.xlane.xlu0 %29 }
  0x9f   :  { %60 = vrsqrt.f32 %v30_v5 }
  0xa8   :  { %v59_v6 = vpop.eup %58 }
  0xa9   :  { %v33_v7 = vmul.f32 %v59_v6, %v23_v0 }
  0xab   :  { %35 = vst [vmem:[#allocation5] sm:$0xff] %v33_v7 }
  0xac   :  { %v61_v8 = vpop.eup %60 }
  0xad   :  { %v34_v9 = vmul.f32 %v61_v8, %v24_v1 }
  0xaf   :  { %36 = vst [vmem:[#allocation5 + $0x8] sm:$0xff] %v34_v9 }
  0xb0   :  { %93 = shalt.err (!%p90_p9)
}
  0xb1   :  { %48 = dma.vmem_to_hbm [thread:$0]  %s43_s14, 256, %s133_s1, [#allocation4], %s107_s9, %s107_s9, %s108_s10  }
  0xb2   :  { %104 = dma.done.wait [#allocation4], 256  }
  0xb3   :  { %105 = vsyncadd [#allocation4], 4294967040 }
  0xb4   :  { %52 = vsyncpa [#allocation3], 1 }
  0xb5   :  { %53 = vsyncpa [#allocation4], 1 }

</bundles_post_ra>
